<compile_context>
chip_gen: v7x
topology: tpu7x:2x2x1
jax: 0.10.0
libtpu: 0.0.40
codegen_flags: <defaults>
</compile_context>

<pallas_src>
import functools

import jax
import jax.numpy as jnp
from jax import lax
from jax.experimental import pallas as pl
from jax.experimental.pallas import tpu as pltpu

num_bond_direction = 3
num_bond_type = 6
num_atom_type = 120
num_chirality_tag = 3


def round_up(x, m):
    return ((x + m - 1) // m) * m


# ----------------------------- Pallas kernels ------------------------------ #
def gin_mlp_kernel(a_ref, h_ref, eagg_ref, w1_ref, b1_ref, w2_ref, b2_ref,
                   out_ref):
    # GIN 'add' aggregation for one row tile:
    #   aggr[i] = sum_j A[i, j] * h[j] + eagg[i]
    # A and h are bf16, accumulation is f32 on the MXU.
    aggr = jnp.dot(a_ref[...], h_ref[...],
                   preferred_element_type=jnp.float32) + eagg_ref[...]
    # MLP: Linear(emb -> 2*emb) -> ReLU -> Linear(2*emb -> emb)   (f32)
    hid = jnp.maximum(
        jnp.dot(aggr, w1_ref[...], preferred_element_type=jnp.float32)
        + b1_ref[...], 0.0)
    out_ref[...] = (jnp.dot(hid, w2_ref[...], preferred_element_type=jnp.float32)
                    + b2_ref[...])


def bn_apply_kernel(h2_ref, scale_ref, shift_ref, out_ref, *, apply_relu):
    # BatchNorm folded into scale/shift (stats precomputed globally in glue).
    y = h2_ref[...] * scale_ref[...] + shift_ref[...]
    if apply_relu:
        y = jnp.maximum(y, 0.0)
    out_ref[...] = y


# ----------------------------- kernel wrappers ------------------------------ #
def gin_mlp(A_bf16, h_bf16, eagg, lp, TM):
    N_pad = A_bf16.shape[0]
    emb_pad = h_bf16.shape[1]
    hid_pad = lp['w1'].shape[1]
    grid = (N_pad // TM,)

    cost = pl.CostEstimate(
        flops=2 * N_pad * N_pad * emb_pad
              + 2 * N_pad * emb_pad * hid_pad
              + 2 * N_pad * hid_pad * emb_pad,
        transcendentals=0,
        bytes_accessed=(A_bf16.size * 2 + h_bf16.size * 2 + eagg.size * 4
                        + (lp['w1'].size + lp['w2'].size
                           + lp['b1'].size + lp['b2'].size) * 4
                        + N_pad * emb_pad * 4),
    )

    return pl.pallas_call(
        gin_mlp_kernel,
        grid=grid,
        in_specs=[
            pl.BlockSpec((TM, N_pad), lambda i: (i, 0)),        # A row tile (bf16)
            pl.BlockSpec((N_pad, emb_pad), lambda i: (0, 0)),   # h, resident (bf16)
            pl.BlockSpec((TM, emb_pad), lambda i: (i, 0)),      # edge aggregate tile
            pl.BlockSpec((emb_pad, hid_pad), lambda i: (0, 0)),  # w1
            pl.BlockSpec((1, hid_pad), lambda i: (0, 0)),        # b1
            pl.BlockSpec((hid_pad, emb_pad), lambda i: (0, 0)),  # w2
            pl.BlockSpec((1, emb_pad), lambda i: (0, 0)),        # b2
        ],
        out_specs=pl.BlockSpec((TM, emb_pad), lambda i: (i, 0)),
        out_shape=jax.ShapeDtypeStruct((N_pad, emb_pad), jnp.float32),
        compiler_params=pltpu.CompilerParams(
            dimension_semantics=("parallel",),
            vmem_limit_bytes=64 * 1024 * 1024),
        cost_estimate=cost,
    )(A_bf16, h_bf16, eagg, lp['w1'], lp['b1'], lp['w2'], lp['b2'])


def bn_apply(h2, scale, shift, apply_relu, TM):
    N_pad, emb_pad = h2.shape
    grid = (N_pad // TM,)
    kern = functools.partial(bn_apply_kernel, apply_relu=apply_relu)
    return pl.pallas_call(
        kern,
        grid=grid,
        in_specs=[
            pl.BlockSpec((TM, emb_pad), lambda i: (i, 0)),
            pl.BlockSpec((1, emb_pad), lambda i: (0, 0)),
            pl.BlockSpec((1, emb_pad), lambda i: (0, 0)),
        ],
        out_specs=pl.BlockSpec((TM, emb_pad), lambda i: (i, 0)),
        out_shape=jax.ShapeDtypeStruct((N_pad, emb_pad), jnp.float32),
        compiler_params=pltpu.CompilerParams(
            dimension_semantics=("parallel",)),
    )(h2, scale, shift)


# ------------------------------- parameters -------------------------------- #
def init_gnn_params(key, num_layer, emb_dim):
    emb_pad = round_up(emb_dim, 128)
    hid_pad = round_up(2 * emb_dim, 128)

    def xavier_emb(k, rows, cols):
        bound = (6.0 / (rows + cols)) ** 0.5
        w = jax.random.uniform(k, (rows, cols), jnp.float32, -bound, bound)
        return jnp.pad(w, ((0, 0), (0, emb_pad - cols)))

    def linear_w(k, fan_in, fan_out, rows_pad, cols_pad):
        lim = 1.0 / (fan_in ** 0.5)          # PyTorch Linear default bound
        w = jax.random.uniform(k, (fan_in, fan_out), jnp.float32, -lim, lim)
        return jnp.pad(w, ((0, rows_pad - fan_in), (0, cols_pad - fan_out)))

    def linear_b(k, fan_in, fan_out, cols_pad):
        lim = 1.0 / (fan_in ** 0.5)
        b = jax.random.uniform(k, (1, fan_out), jnp.float32, -lim, lim)
        return jnp.pad(b, ((0, 0), (0, cols_pad - fan_out)))

    keys = jax.random.split(key, 2 + num_layer * 6)
    params = {
        'emb_dim': emb_dim,
        'emb_pad': emb_pad,
        'hid_pad': hid_pad,
        'x_emb1': xavier_emb(keys[0], num_atom_type, emb_dim),
        'x_emb2': xavier_emb(keys[1], num_chirality_tag, emb_dim),
        'layers': [],
    }
    ki = 2
    for _ in range(num_layer):
        k = keys[ki:ki + 6]
        ki += 6
        gamma = jnp.pad(jnp.ones((1, emb_dim), jnp.float32),
                        ((0, 0), (0, emb_pad - emb_dim)))
        params['layers'].append({
            'e_emb1': xavier_emb(k[0], num_bond_type, emb_dim),
            'e_emb2': xavier_emb(k[1], num_bond_direction, emb_dim),
            'w1': linear_w(k[2], emb_dim, 2 * emb_dim, emb_pad, hid_pad),
            'b1': linear_b(k[3], emb_dim, 2 * emb_dim, hid_pad),
            'w2': linear_w(k[4], 2 * emb_dim, emb_dim, hid_pad, emb_pad),
            'b2': linear_b(k[5], 2 * emb_dim, emb_dim, emb_pad),
            'gamma': gamma,
            'beta': jnp.zeros((1, emb_pad), jnp.float32),
        })
    return params


# ------------------------------ forward pass -------------------------------- #
def gnn_forward(params, x, edge_index, edge_attr, num_layer, JK='last'):
    if num_layer < 2:
        raise ValueError('Number of GNN layers must be greater than 1.')
    N = x.shape[0]
    emb_dim = params['emb_dim']
    emb_pad = params['emb_pad']

    # node-row tiling (pad N so the bf16 sublane tile of 16 and the row tile
    # divide evenly; TM=256 keeps double-buffered A tiles small enough for
    # v7x's 64 MiB VMEM even at large N).
    if N <= 256:
        TM = round_up(N, 16)
        N_pad = TM
    else:
        TM = 256
        N_pad = round_up(N, TM)

    # initial node embedding (gather glue), padded to lane-dense layout
    h = params['x_emb1'][x[:, 0]] + params['x_emb2'][x[:, 1]]      # (N, emb_pad)
    h = jnp.pad(h, ((0, N_pad - N), (0, 0)))

    # add self loops + self-loop edge attrs ([4, 0])
    loops = jnp.arange(N, dtype=edge_index.dtype)
    src = jnp.concatenate([edge_index[0], loops])
    tgt = jnp.concatenate([edge_index[1], loops])
    self_loop_attr = jnp.stack(
        [jnp.full((N,), 4, edge_attr.dtype), jnp.zeros((N,), edge_attr.dtype)],
        axis=1)
    ea = jnp.concatenate([edge_attr, self_loop_attr], axis=0)

    # dense target-major adjacency (edge multiplicities), stored in bf16
    # (values are small integers -> exact in bf16).
    A = (jnp.zeros((N_pad, N_pad), jnp.float32)
         .at[tgt, src].add(1.0)
         .astype(jnp.bfloat16))

    h_list = [h]
    for layer in range(num_layer):
        lp = params['layers'][layer]
        # edge-embedding aggregate (independent of h) precomputed in glue
        edge_emb = lp['e_emb1'][ea[:, 0]] + lp['e_emb2'][ea[:, 1]]
        eagg = jax.ops.segment_sum(edge_emb, tgt, num_segments=N_pad)

        # aggregation + GIN MLP (tiled Pallas kernel)
        h2 = gin_mlp(A, h_list[layer].astype(jnp.bfloat16), eagg, lp, TM)

        # BatchNorm1d (training-mode batch statistics over the real N rows,
        # biased variance, eps=1e-5) -> folded into scale/shift
        mean = jnp.mean(h2[:N], axis=0, keepdims=True)
        var = jnp.mean((h2[:N] - mean) ** 2, axis=0, keepdims=True)
        scale = lp['gamma'] * lax.rsqrt(var + 1e-5)
        shift = lp['beta'] - mean * scale

        apply_relu = layer != num_layer - 1
        h_new = bn_apply(h2, scale, shift, apply_relu, TM)
        # TODO(synk): dropout only implemented for drop_ratio=0.0 (identity)
        h_list.append(h_new)

    outs = [hh[:N, :emb_dim] for hh in h_list]
    if JK == 'last':
        return outs[-1]
    elif JK == 'concat':
        return jnp.concatenate(outs, axis=1)
    elif JK == 'max':
        return jnp.max(jnp.stack(outs, axis=0), axis=0)
    elif JK == 'sum':
        return jnp.sum(jnp.stack(outs, axis=0), axis=0)
    raise ValueError('not implemented.')


# --------------------------- pure-JAX reference ----------------------------- #
def gnn_forward_ref(params, x, edge_index, edge_attr, num_layer, eps=1e-5):
    # Mirrors the kernel path semantics (incl. the bf16 cast of h for the
    # aggregation) but uses segment_sum instead of a dense adjacency matmul.
    N = x.shape[0]
    emb_dim = params['emb_dim']
    h = params['x_emb1'][x[:, 0]] + params['x_emb2'][x[:, 1]]
    loops = jnp.arange(N, dtype=edge_index.dtype)
    src = jnp.concatenate([edge_index[0], loops])
    tgt = jnp.concatenate([edge_index[1], loops])
    self_loop_attr = jnp.stack(
        [jnp.full((N,), 4, edge_attr.dtype), jnp.zeros((N,), edge_attr.dtype)],
        axis=1)
    ea = jnp.concatenate([edge_attr, self_loop_attr], axis=0)
    for layer in range(num_layer):
        lp = params['layers'][layer]
        edge_emb = lp['e_emb1'][ea[:, 0]] + lp['e_emb2'][ea[:, 1]]
        hb = h.astype(jnp.bfloat16).astype(jnp.float32)
        aggr = (jax.ops.segment_sum(hb[src], tgt, num_segments=N)
                + jax.ops.segment_sum(edge_emb, tgt, num_segments=N))
        hid = jnp.maximum(aggr @ lp['w1'] + lp['b1'], 0.0)
        h2 = hid @ lp['w2'] + lp['b2']
        mean = jnp.mean(h2, axis=0, keepdims=True)
        var = jnp.mean((h2 - mean) ** 2, axis=0, keepdims=True)
        h = (h2 - mean) * lax.rsqrt(var + eps) * lp['gamma'] + lp['beta']
        if layer != num_layer - 1:
            h = jnp.maximum(h, 0.0)
    return h[:, :emb_dim]


# ---------------------------------- main ------------------------------------ #
if __name__ == "__main__":
    key = jax.random.PRNGKey(0)
    k_param, k_x1, k_x2, k_ei, k_ea1, k_ea2 = jax.random.split(key, 6)

    N, E, emb_dim, num_layer = 8, 16, 32, 2

    x = jnp.stack([
        jax.random.randint(k_x1, (N,), 0, num_atom_type),
        jax.random.randint(k_x2, (N,), 0, num_chirality_tag),
    ], axis=1).astype(jnp.int32)                                   # [N, 2]
    edge_index = jax.random.randint(k_ei, (2, E), 0, N).astype(jnp.int32)  # [2, E]
    edge_attr = jnp.stack([
        jax.random.randint(k_ea1, (E,), 0, num_bond_type),
        jax.random.randint(k_ea2, (E,), 0, num_bond_direction),
    ], axis=1).astype(jnp.int32)                                   # [E, 2]

    params = init_gnn_params(k_param, num_layer, emb_dim)

    out = gnn_forward(params, x, edge_index, edge_attr, num_layer, JK='last')
    out = jax.block_until_ready(out)

    ref = gnn_forward_ref(params, x, edge_index, edge_attr, num_layer)
    assert out.shape == (N, emb_dim)
    assert jnp.allclose(out, ref, atol=5e-4, rtol=5e-4), "mismatch vs reference"

    print("KERNEL_OK")
</pallas_src>

<mosaic_0001>
module attributes {stable_mosaic.version = 11 : i64} {
  func.func @gin_mlp_kernel(%arg0: i32, %arg1: memref<16x16xbf16, #tpu.memory_space<vmem>>, %arg2: memref<16x128xbf16, #tpu.memory_space<vmem>>, %arg3: memref<16x128xf32, #tpu.memory_space<vmem>>, %arg4: memref<128x128xf32, #tpu.memory_space<vmem>>, %arg5: memref<1x128xf32, #tpu.memory_space<vmem>>, %arg6: memref<128x128xf32, #tpu.memory_space<vmem>>, %arg7: memref<1x128xf32, #tpu.memory_space<vmem>>, %arg8: memref<16x128xf32, #tpu.memory_space<vmem>>) attributes {dimension_semantics = [#tpu.dimension_semantics<parallel>], iteration_bounds = array<i64: 1>, scalar_prefetch = 0 : i64, scratch_operands = 0 : i64, tpu.core_type = #tpu.core_type<tc>, window_params = [{transform_indices = @transform_0, window_bounds = array<i64: 16, 16>}, {pipeline_mode = #tpu.pipeline_mode<synchronous>, transform_indices = @transform_1, window_bounds = array<i64: 16, 128>}, {transform_indices = @transform_2, window_bounds = array<i64: 16, 128>}, {pipeline_mode = #tpu.pipeline_mode<synchronous>, transform_indices = @transform_3, window_bounds = array<i64: 128, 128>}, {pipeline_mode = #tpu.pipeline_mode<synchronous>, transform_indices = @transform_4, window_bounds = array<i64: 1, 128>}, {pipeline_mode = #tpu.pipeline_mode<synchronous>, transform_indices = @transform_5, window_bounds = array<i64: 128, 128>}, {pipeline_mode = #tpu.pipeline_mode<synchronous>, transform_indices = @transform_6, window_bounds = array<i64: 1, 128>}, {transform_indices = @transform_7, window_bounds = array<i64: 16, 128>}]} {
    %c0 = arith.constant 0 : index
    %c0_0 = arith.constant 0 : index
    %0 = vector.load %arg1[%c0, %c0_0] : memref<16x16xbf16, #tpu.memory_space<vmem>>, vector<16x16xbf16>
    %c0_1 = arith.constant 0 : index
    %c0_2 = arith.constant 0 : index
    %1 = vector.load %arg2[%c0_1, %c0_2] : memref<16x128xbf16, #tpu.memory_space<vmem>>, vector<16x128xbf16>
    %cst = arith.constant dense<0.000000e+00> : vector<16x128xf32>
    %2 = tpu.matmul %0, %1, %cst {dimension_numbers = #tpu.dot_dimension_numbers<[1], [0], [0], [1], [0, 0, 1, 1], [], []>} : vector<16x16xbf16>, vector<16x128xbf16>, vector<16x128xf32> -> vector<16x128xf32>
    %c0_3 = arith.constant 0 : index
    %c0_4 = arith.constant 0 : index
    %3 = vector.load %arg3[%c0_3, %c0_4] : memref<16x128xf32, #tpu.memory_space<vmem>>, vector<16x128xf32>
    %4 = arith.addf %2, %3 : vector<16x128xf32>
    %c0_5 = arith.constant 0 : index
    %c0_6 = arith.constant 0 : index
    %5 = vector.load %arg4[%c0_5, %c0_6] : memref<128x128xf32, #tpu.memory_space<vmem>>, vector<128x128xf32>
    %cst_7 = arith.constant dense<0.000000e+00> : vector<16x128xf32>
    %6 = tpu.matmul %4, %5, %cst_7 {dimension_numbers = #tpu.dot_dimension_numbers<[1], [0], [0], [1], [0, 0, 1, 1], [], []>} : vector<16x128xf32>, vector<128x128xf32>, vector<16x128xf32> -> vector<16x128xf32>
    %c0_8 = arith.constant 0 : index
    %c0_9 = arith.constant 0 : index
    %7 = vector.load %arg5[%c0_8, %c0_9] : memref<1x128xf32, #tpu.memory_space<vmem>>, vector<1x128xf32>
    %8 = vector.broadcast %7 : vector<1x128xf32> to vector<16x128xf32>
    %9 = arith.addf %6, %8 : vector<16x128xf32>
    %cst_10 = arith.constant 0.000000e+00 : f32
    %10 = vector.broadcast %cst_10 : f32 to vector<16x128xf32>
    %11 = arith.maximumf %9, %10 : vector<16x128xf32>
    %c0_11 = arith.constant 0 : index
    %c0_12 = arith.constant 0 : index
    %12 = vector.load %arg6[%c0_11, %c0_12] : memref<128x128xf32, #tpu.memory_space<vmem>>, vector<128x128xf32>
    %cst_13 = arith.constant dense<0.000000e+00> : vector<16x128xf32>
    %13 = tpu.matmul %11, %12, %cst_13 {dimension_numbers = #tpu.dot_dimension_numbers<[1], [0], [0], [1], [0, 0, 1, 1], [], []>} : vector<16x128xf32>, vector<128x128xf32>, vector<16x128xf32> -> vector<16x128xf32>
    %c0_14 = arith.constant 0 : index
    %c0_15 = arith.constant 0 : index
    %14 = vector.load %arg7[%c0_14, %c0_15] : memref<1x128xf32, #tpu.memory_space<vmem>>, vector<1x128xf32>
    %15 = vector.broadcast %14 : vector<1x128xf32> to vector<16x128xf32>
    %16 = arith.addf %13, %15 : vector<16x128xf32>
    %c0_16 = arith.constant 0 : index
    %c0_17 = arith.constant 0 : index
    %17 = vector.load %arg8[%c0_16, %c0_17] : memref<16x128xf32, #tpu.memory_space<vmem>>, vector<16x128xf32>
    tpu.vector_store %arg8[%c0_16, %c0_17], %16 {strides = array<i32>} : memref<16x128xf32, #tpu.memory_space<vmem>>, vector<16x128xf32>,
    return
  }
  func.func @transform_0(%arg0: i32) -> (i32, i32) {
    %c0_i32 = arith.constant 0 : i32
    %c0_i32_0 = arith.constant 0 : i32
    return %arg0, %c0_i32 : i32, i32
  }
  func.func @transform_1(%arg0: i32) -> (i32, i32) {
    %c0_i32 = arith.constant 0 : i32
    %c0_i32_0 = arith.constant 0 : i32
    %c0_i32_1 = arith.constant 0 : i32
    return %c0_i32, %c0_i32_0 : i32, i32
  }
  func.func @transform_2(%arg0: i32) -> (i32, i32) {
    %c0_i32 = arith.constant 0 : i32
    %c0_i32_0 = arith.constant 0 : i32
    return %arg0, %c0_i32 : i32, i32
  }
  func.func @transform_3(%arg0: i32) -> (i32, i32) {
    %c0_i32 = arith.constant 0 : i32
    %c0_i32_0 = arith.constant 0 : i32
    %c0_i32_1 = arith.constant 0 : i32
    return %c0_i32, %c0_i32_0 : i32, i32
  }
  func.func @transform_4(%arg0: i32) -> (i32, i32) {
    %c0_i32 = arith.constant 0 : i32
    %c0_i32_0 = arith.constant 0 : i32
    %c0_i32_1 = arith.constant 0 : i32
    return %c0_i32, %c0_i32_0 : i32, i32
  }
  func.func @transform_5(%arg0: i32) -> (i32, i32) {
    %c0_i32 = arith.constant 0 : i32
    %c0_i32_0 = arith.constant 0 : i32
    %c0_i32_1 = arith.constant 0 : i32
    return %c0_i32, %c0_i32_0 : i32, i32
  }
  func.func @transform_6(%arg0: i32) -> (i32, i32) {
    %c0_i32 = arith.constant 0 : i32
    %c0_i32_0 = arith.constant 0 : i32
    %c0_i32_1 = arith.constant 0 : i32
    return %c0_i32, %c0_i32_0 : i32, i32
  }
  func.func @transform_7(%arg0: i32) -> (i32, i32) {
    %c0_i32 = arith.constant 0 : i32
    %c0_i32_0 = arith.constant 0 : i32
    return %arg0, %c0_i32 : i32, i32
  }
}

</mosaic_0001>

<bundles_post_ra>
// kernel: tpu_custom_call.1
= control target key start
LH: loop header
LB: loop body
LE: loop exit
PB: predicated region body
PF: predicated region fallthrough
CT: control target
= control target key end

     0   :  { %12 = vsyncpa [#allocation3], 0  ;;  %s954_s0 = inlined_call_operand.hbm [shape: bf16[16,16], index: 0, kind: input, shape index: {}]   ;;  %s955_s1 = inlined_call_operand.hbm [shape: bf16[16,128], index: 1, kind: input, shape index: {}]   ;;  %s956_s2 = inlined_call_operand.hbm [shape: f32[16,128], index: 2, kind: input, shape index: {}]   ;;  %s957_s3 = inlined_call_operand.hbm [shape: f32[128,128], index: 3, kind: input, shape index: {}]   ;;  %s958_s4 = inlined_call_operand.hbm [shape: f32[1,128], index: 4, kind: input, shape index: {}]   ;;  %s959_s5 = inlined_call_operand.hbm [shape: f32[128,128], index: 5, kind: input, shape index: {}]   ;;  %s960_s6 = inlined_call_operand.hbm [shape: f32[1,128], index: 6, kind: input, shape index: {}]   ;;  %s961_s7 = inlined_call_operand.hbm [shape: f32[16,128], index: 7, kind: output, shape index: {}]  }
   0x1   :  { %13 = vsyncpa [#allocation6], 0 }
   0x2   :  { %14 = vsyncpa [#allocation9], 0 }
   0x3   :  { %15 = vsyncpa [#allocation12], 0 }
   0x4   :  { %16 = vsyncpa [#allocation4], 0  ;;  %s786_s24 = smov [#allocation5]   ;;  %s600_s28 = scalar_lea.hbm %s955_s1, 128 }
   0x5   :  { %s34_s25 = sshll.u32 %s786_s24, 4  ;;  %p601_p0 = scmp.ne.s32.totalorder %s955_s1, %s600_s28  ;;  %s35_s25 = int_to_ptr.vmem [resolvable:$true] %s34_s25 }
   0x6   :  { %p604_p1 = scmp.lt.u32.totalorder %s600_s28, %s955_s1 }
   0x8   :  { %p606_p2 = pnand %p604_p1, %p601_p0 }
   0xa   :  { %609 = shalt.err (!%p606_p2)
}
   0xb   :  { %s610_s10 = scalar_lea.vmem %s35_s25, 128  ;;  %p615_p4 = scmp.lt.s32.totalorder %s35_s25, %s35_s25 }
   0xc   :  { %p611_p3 = scmp.ne.s32.totalorder %s35_s25, %s610_s10  ;;  %p616_p5 = scmp.lt.s32.totalorder %s610_s10, %s610_s10 }
   0xe   :  { %p617_p6 = por %p616_p5, %p615_p4 }
  0x10   :  { %p618_p7 = pnand %p617_p6, %p611_p3 }
  0x12   :  { %621 = shalt.err (!%p618_p7)
}
  0x13   :  { %s787_s11 = smov 64   ;;  %s788_s12 = smov 4  }
  0x14   :  { %40 = dma.hbm_to_vmem [thread:$0]  %s955_s1, 128, %s35_s25, [#allocation6], %s787_s11, %s787_s11, %s788_s12  }
  0x15   :  { %s789_s15 = smov [#allocation8]   ;;  %s790_s17 = smov [#allocation11]  }
  0x16   :  { %s58_s16 = sshll.u32 %s789_s15, 4  ;;  %s80_s18 = sshll.u32 %s790_s17, 4  ;;  %s59_s16 = int_to_ptr.vmem [resolvable:$true] %s58_s16  ;;  %s81_s18 = int_to_ptr.vmem [resolvable:$true] %s80_s18 }
  0x17   :  { %s622_s21 = scalar_lea.hbm %s957_s3, 2048 }
  0x18   :  { %p623_p8 = scmp.ne.s32.totalorder %s957_s3, %s622_s21  ;;  %p626_p9 = scmp.lt.u32.totalorder %s622_s21, %s957_s3 }
  0x1a   :  { %p628_p10 = pnand %p626_p9, %p623_p8 }
  0x1c   :  { %631 = shalt.err (!%p628_p10)
}
  0x1d   :  { %s632_s1 = scalar_lea.vmem %s59_s16, 2048  ;;  %p637_p12 = scmp.lt.s32.totalorder %s59_s16, %s59_s16 }
  0x1e   :  { %p633_p11 = scmp.ne.s32.totalorder %s59_s16, %s632_s1  ;;  %p638_p13 = scmp.lt.s32.totalorder %s632_s1, %s632_s1 }
  0x20   :  { %p639_p0 = por %p638_p13, %p637_p12 }
  0x22   :  { %p640_p1 = pnand %p639_p0, %p633_p11 }
  0x24   :  { %643 = shalt.err (!%p640_p1)
}
  0x25   :  { %s791_s25 = smov 128   ;;  %s792_s27 = smov 8  }
  0x26   :  { %64 = dma.hbm_to_vmem [thread:$0]  %s957_s3, 2048, %s59_s16, [#allocation9], %s791_s25, %s791_s25, %s792_s27  }
  0x27   :  { %s644_s9 = scalar_lea.hbm %s959_s5, 2048 }
  0x28   :  { %p645_p2 = scmp.ne.s32.totalorder %s959_s5, %s644_s9  ;;  %p648_p3 = scmp.lt.u32.totalorder %s644_s9, %s959_s5 }
  0x2a   :  { %p650_p4 = pnand %p648_p3, %p645_p2 }
  0x2c   :  { %653 = shalt.err (!%p650_p4)
}
  0x2d   :  { %s654_s17 = scalar_lea.vmem %s81_s18, 2048  ;;  %p659_p6 = scmp.lt.s32.totalorder %s81_s18, %s81_s18 }
  0x2e   :  { %p655_p5 = scmp.ne.s32.totalorder %s81_s18, %s654_s17  ;;  %p660_p7 = scmp.lt.s32.totalorder %s654_s17, %s654_s17 }
  0x30   :  { %p661_p8 = por %p660_p7, %p659_p6 }
  0x32   :  { %p662_p9 = pnand %p661_p8, %p655_p5 }
  0x34   :  { %665 = shalt.err (!%p662_p9)
}
  0x35   :  { %86 = dma.hbm_to_vmem [thread:$0]  %s959_s5, 2048, %s81_s18, [#allocation12], %s791_s25, %s791_s25, %s792_s27  }
  0x36   :  { %s793_s19 = smov [#allocation2]   ;;  %s794_s21 = smov [#allocation7]  }
  0x37   :  { %s22_s20 = sshll.u32 %s793_s19, 4  ;;  %s46_s22 = sshll.u32 %s794_s21, 4  ;;  %s23_s20 = int_to_ptr.vmem [resolvable:$true] %s22_s20  ;;  %s47_s22 = int_to_ptr.vmem [resolvable:$true] %s46_s22 }
  0x38   :  { %s666_s26 = scalar_lea.hbm %s954_s0, 128 }
  0x39   :  { %p667_p10 = scmp.ne.s32.totalorder %s954_s0, %s666_s26  ;;  %p670_p11 = scmp.lt.u32.totalorder %s666_s26, %s954_s0 }
  0x3b   :  { %p672_p12 = pnand %p670_p11, %p667_p10 }
  0x3d   :  { %675 = shalt.err (!%p672_p12)
}
  0x3e   :  { %s676_s5 = scalar_lea.vmem %s23_s20, 128  ;;  %p681_p0 = scmp.lt.s32.totalorder %s23_s20, %s23_s20 }
  0x3f   :  { %p677_p13 = scmp.ne.s32.totalorder %s23_s20, %s676_s5  ;;  %p682_p1 = scmp.lt.s32.totalorder %s676_s5, %s676_s5 }
  0x41   :  { %p683_p2 = por %p682_p1, %p681_p0 }
  0x43   :  { %p684_p3 = pnand %p683_p2, %p677_p13 }
  0x45   :  { %687 = shalt.err (!%p684_p3)
}
  0x46   :  { %28 = dma.hbm_to_vmem [thread:$0]  %s954_s0, 128, %s23_s20, [#allocation3], %s787_s11, %s787_s11, %s788_s12  }
  0x47   :  { %s688_s13 = scalar_lea.hbm %s956_s2, 256 }
  0x48   :  { %p689_p4 = scmp.ne.s32.totalorder %s956_s2, %s688_s13  ;;  %p692_p5 = scmp.lt.u32.totalorder %s688_s13, %s956_s2 }
  0x4a   :  { %p694_p6 = pnand %p692_p5, %p689_p4 }
  0x4c   :  { %697 = shalt.err (!%p694_p6)
}
  0x4d   :  { %s698_s16 = scalar_lea.vmem %s47_s22, 256  ;;  %p703_p8 = scmp.lt.s32.totalorder %s47_s22, %s47_s22 }
  0x4e   :  { %p699_p7 = scmp.ne.s32.totalorder %s47_s22, %s698_s16  ;;  %p704_p9 = scmp.lt.s32.totalorder %s698_s16, %s698_s16 }
  0x50   :  { %p705_p10 = por %p704_p9, %p703_p8 }
  0x52   :  { %p706_p11 = pnand %p705_p10, %p699_p7 }
  0x54   :  { %709 = shalt.err (!%p706_p11)
}
  0x55   :  { %52 = dma.hbm_to_vmem [thread:$0]  %s956_s2, 256, %s47_s22, [#allocation6], %s791_s25, %s791_s25, %s792_s27  }
  0x56   :  { %s795_s12 = smov [#allocation10]   ;;  %s796_s20 = smov [#allocation13]  }
  0x57   :  { %s71_s19 = sshll.u32 %s795_s12, 4  ;;  %s93_s21 = sshll.u32 %s796_s20, 4  ;;  %s72_s19 = int_to_ptr.vmem [resolvable:$true] %s71_s19  ;;  %s94_s21 = int_to_ptr.vmem [resolvable:$true] %s93_s21 }
  0x58   :  { %s710_s26 = scalar_lea.hbm %s958_s4, 16 }
  0x59   :  { %p711_p12 = scmp.ne.s32.totalorder %s958_s4, %s710_s26  ;;  %p714_p13 = scmp.lt.u32.totalorder %s710_s26, %s958_s4 }
  0x5b   :  { %p716_p0 = pnand %p714_p13, %p711_p12 }
  0x5d   :  { %719 = shalt.err (!%p716_p0)
}
  0x5e   :  { %s720_s2 = scalar_lea.vmem %s72_s19, 16  ;;  %s724_s22 = scalar_lea.vmem %s72_s19, 32 }
  0x5f   :  { %p721_p1 = scmp.ne.s32.totalorder %s72_s19, %s720_s2  ;;  %p725_p2 = scmp.lt.s32.totalorder %s72_s19, %s72_s19 }
  0x60   :  { %p726_p3 = scmp.lt.s32.totalorder %s724_s22, %s720_s2 }
  0x62   :  { %p727_p4 = por %p726_p3, %p725_p2 }
  0x64   :  { %p728_p5 = pnand %p727_p4, %p721_p1 }
  0x66   :  { %731 = shalt.err (!%p728_p5)
}
  0x67   :  { %74 = dma.hbm_to_vmem [thread:$0]  %s958_s4, 16, %s72_s19, [#allocation9]  }
  0x68   :  { %s732_s10 = scalar_lea.hbm %s960_s6, 16 }
  0x69   :  { %p733_p6 = scmp.ne.s32.totalorder %s960_s6, %s732_s10  ;;  %p736_p7 = scmp.lt.u32.totalorder %s732_s10, %s960_s6 }
  0x6b   :  { %p738_p8 = pnand %p736_p7, %p733_p6 }
  0x6d   :  { %741 = shalt.err (!%p738_p8)
}
  0x6e   :  { %s742_s3 = scalar_lea.vmem %s94_s21, 16  ;;  %s746_s16 = scalar_lea.vmem %s94_s21, 32 }
  0x6f   :  { %p743_p9 = scmp.ne.s32.totalorder %s94_s21, %s742_s3  ;;  %p747_p10 = scmp.lt.s32.totalorder %s94_s21, %s94_s21 }
  0x70   :  { %p748_p11 = scmp.lt.s32.totalorder %s746_s16, %s742_s3 }
  0x72   :  { %p749_p12 = por %p748_p11, %p747_p10 }
  0x74   :  { %p750_p13 = pnand %p749_p12, %p743_p9 }
  0x76   :  { %753 = shalt.err (!%p750_p13)
}
  0x77   :  { %96 = dma.hbm_to_vmem [thread:$0]  %s960_s6, 16, %s94_s21, [#allocation12]  }
  0x78   :  { %776 = dma.done.wait [#allocation3], 128  }
  0x79   :  { %777 = vsyncadd [#allocation3], 4294967168 }
  0x7a   :  { %778 = dma.done.wait [#allocation6], 384  }
  0x7b   :  { %779 = vsyncadd [#allocation6], 4294966912 }
  0x7c   :  { %780 = dma.done.wait [#allocation9], 2064  }
  0x7d   :  { %781 = vsyncadd [#allocation9], 4294965232 }
  0x7e   :  { %782 = dma.done.wait [#allocation12], 2064  }
  0x7f   :  { %783 = vsyncadd [#allocation12], 4294965232  ;;  %v797_v0 = vmov 0.0   ;;  %vm798_vm0 = vmmov 0   ;;  %v598_v1 = vld [vmem:[#allocation5] sm:$0xff]   ;;  %v599_v2 = vld [vmem:[#allocation2] sm:$0xff]  }
  0x80   :  { %444 = vmatprep.subr.bf16.mxu0 %v797_v0  ;;  %446 = vmatprep.mubr.msk.bf16.mxu0 %vm798_vm0, %v797_v0  ;;  %vm136_vm1 = vcmask 130048   ;;  %v181_v3 = vld [vmem:[#allocation8] sm:$0xff]  ;;  %v182_v4 = vld [vmem:[#allocation8 + $0x8] sm:$0xff]  ;;  %v183_v5 = vld [vmem:[#allocation8 + $0x10] sm:$0xff]  ;;  %s799_s6 = smov [#allocation14]  }
  0x81   :  { %445 = vmatpush3.bf16.msra.mxu0 %v598_v1  ;;  %v520_v6 = vpack.c.bf16 %v182_v4, %v181_v3  ;;  %v184_v7 = vld [vmem:[#allocation8 + $0x18] sm:$0xff]  ;;  %v185_v9 = vld [vmem:[#allocation8 + $0x20] sm:$0xff]  ;;  %v186_v10 = vld [vmem:[#allocation8 + $0x28] sm:$0xff]  ;;  %s386_s11 = sshll.u32 %s799_s6, 4  ;;  %s387_s11 = int_to_ptr.vmem [resolvable:$true] %s386_s11 }
  0x82   :  { %v524_v8 = vpack.c.bf16 %v184_v7, %v183_v5  ;;  %v528_v11 = vpack.c.bf16 %v186_v10, %v185_v9  ;;  %v187_v12 = vld [vmem:[#allocation8 + $0x30] sm:$0xff]  ;;  %v188_v13 = vld [vmem:[#allocation8 + $0x38] sm:$0xff]  ;;  %v189_v15 = vld [vmem:[#allocation8 + $0x40] sm:$0xff]  ;;  %s754_s12 = scalar_lea.vmem %s387_s11, 256  ;;  %p759_p1 = scmp.lt.s32.totalorder %s387_s11, %s387_s11 }
  0x83   :  { %521 = vmatprep.subr.bf16.mxu1 %v520_v6  ;;  %v532_v14 = vpack.c.bf16 %v188_v13, %v187_v12  ;;  %v190_v16 = vld [vmem:[#allocation8 + $0x48] sm:$0xff]  ;;  %v191_v18 = vld [vmem:[#allocation8 + $0x50] sm:$0xff]  ;;  %v192_v19 = vld [vmem:[#allocation8 + $0x58] sm:$0xff]  ;;  %p755_p0 = scmp.ne.s32.totalorder %s387_s11, %s754_s12  ;;  %p760_p2 = scmp.lt.s32.totalorder %s754_s12, %s754_s12 }
  0x84   :  { %447 = vmatmul.mubr.msk.bf16.vlgmr.msra.gmra.mrb[0].mxu0 %vm136_vm1, %v599_v2  ;;  %523 = vmatpush3.bf16.msra.mxu1 %v520_v6  ;;  %v536_v17 = vpack.c.bf16 %v190_v16, %v189_v15  ;;  %v540_v20 = vpack.c.bf16 %v192_v19, %v191_v18  ;;  %v193_v21 = vld [vmem:[#allocation8 + $0x60] sm:$0xff]  ;;  %v194_v22 = vld [vmem:[#allocation8 + $0x68] sm:$0xff]  ;;  %v195_v24 = vld [vmem:[#allocation8 + $0x70] sm:$0xff] }
  0x85   :  { %525 = vmatprep.subr.bf16.mxu1 %v524_v8  ;;  %v544_v23 = vpack.c.bf16 %v194_v22, %v193_v21  ;;  %v196_v25 = vld [vmem:[#allocation8 + $0x78] sm:$0xff]  ;;  %v281_v27 = vld [vmem:[#allocation11] sm:$0xff]  ;;  %v282_v28 = vld [vmem:[#allocation11 + $0x8] sm:$0xff]  ;;  %p761_p3 = por %p760_p2, %p759_p1 }
  0x86   :  { %v548_v26 = vpack.c.bf16 %v196_v25, %v195_v24  ;;  %v283_v29 = vld [vmem:[#allocation11 + $0x10] sm:$0xff]  ;;  %v552_v30 = vpack.c.bf16 %v282_v28, %v281_v27  ;;  %v284_v31 = vld [vmem:[#allocation11 + $0x18] sm:$0xff]  ;;  %v285_v33 = vld [vmem:[#allocation11 + $0x20] sm:$0xff] }
  0x87   :  { %v556_v32 = vpack.c.bf16 %v284_v31, %v283_v29  ;;  %v286_v34 = vld [vmem:[#allocation11 + $0x28] sm:$0xff]  ;;  %v287_v36 = vld [vmem:[#allocation11 + $0x30] sm:$0xff]  ;;  %v288_v37 = vld [vmem:[#allocation11 + $0x38] sm:$0xff]  ;;  %p762_p4 = pnand %p761_p3, %p755_p0 }
  0x88   :  { %527 = vmatpush3.bf16.msra.mxu1 %v524_v8  ;;  %553 = vmatprep.subr.bf16.mxu0 %v552_v30  ;;  %v560_v35 = vpack.c.bf16 %v286_v34, %v285_v33  ;;  %v564_v38 = vpack.c.bf16 %v288_v37, %v287_v36  ;;  %v289_v39 = vld [vmem:[#allocation11 + $0x40] sm:$0xff]  ;;  %v290_v40 = vld [vmem:[#allocation11 + $0x48] sm:$0xff]  ;;  %v291_v42 = vld [vmem:[#allocation11 + $0x50] sm:$0xff] }
  0x89   :  { %529 = vmatprep.subr.bf16.mxu1 %v528_v11  ;;  %555 = vmatpush3.bf16.msra.mxu0 %v552_v30  ;;  %v568_v41 = vpack.c.bf16 %v290_v40, %v289_v39  ;;  %v292_v43 = vld [vmem:[#allocation11 + $0x58] sm:$0xff]  ;;  %v293_v45 = vld [vmem:[#allocation11 + $0x60] sm:$0xff]  ;;  %v294_v46 = vld [vmem:[#allocation11 + $0x68] sm:$0xff] }
  0x8a   :  { %557 = vmatprep.subr.bf16.mxu0 %v556_v32  ;;  %v572_v44 = vpack.c.bf16 %v292_v43, %v291_v42  ;;  %v576_v47 = vpack.c.bf16 %v294_v46, %v293_v45  ;;  %v123_v48 = vld [vmem:[#allocation7] sm:$0xff]  ;;  %v124_v50 = vld [vmem:[#allocation7 + $0x8] sm:$0xff]  ;;  %v404_v59 = vld [vmem:[#allocation10] ss:$0 sm:$0xff] }
  0x8b   :  { %v295_v56 = vld [vmem:[#allocation11 + $0x70] sm:$0xff]  ;;  %v296_v57 = vld [vmem:[#allocation11 + $0x78] sm:$0xff]  ;;  %v405_v2 = vld [vmem:[#allocation13] ss:$0 sm:$0xff] }
  0x8c   :  { %531 = vmatpush3.bf16.msra.mxu1 %v528_v11  ;;  %v580_v58 = vpack.c.bf16 %v296_v57, %v295_v56 }
  0x8d   :  { %533 = vmatprep.subr.bf16.mxu1 %v532_v14  ;;  %559 = vmatpush3.bf16.msra.mxu0 %v556_v32 }
  0x8e   :  { %561 = vmatprep.subr.bf16.mxu0 %v560_v35 }
  0x90   :  { %535 = vmatpush3.bf16.msra.mxu1 %v532_v14 }
  0x91   :  { %537 = vmatprep.subr.bf16.mxu1 %v536_v17  ;;  %563 = vmatpush3.bf16.msra.mxu0 %v560_v35 }
  0x92   :  { %565 = vmatprep.subr.bf16.mxu0 %v564_v38 }
  0x94   :  { %539 = vmatpush3.bf16.msra.mxu1 %v536_v17 }
  0x95   :  { %541 = vmatprep.subr.bf16.mxu1 %v540_v20  ;;  %567 = vmatpush3.bf16.msra.mxu0 %v564_v38 }
  0x96   :  { %569 = vmatprep.subr.bf16.mxu0 %v568_v41 }
  0x98   :  { %543 = vmatpush3.bf16.msra.mxu1 %v540_v20 }
  0x99   :  { %545 = vmatprep.subr.bf16.mxu1 %v544_v23  ;;  %571 = vmatpush3.bf16.msra.mxu0 %v568_v41 }
  0x9a   :  { %573 = vmatprep.subr.bf16.mxu0 %v572_v44 }
  0x9c   :  { %547 = vmatpush3.bf16.msra.mxu1 %v544_v23 }
  0x9d   :  { %549 = vmatprep.subr.bf16.mxu1 %v548_v26  ;;  %575 = vmatpush3.bf16.msra.mxu0 %v572_v44 }
  0x9e   :  { %577 = vmatprep.subr.bf16.mxu0 %v576_v47 }
  0xa0   :  { %551 = vmatpush3.bf16.msra.mxu1 %v548_v26 }
  0xa1   :  { %579 = vmatpush3.bf16.msra.mxu0 %v576_v47 }
  0xa2   :  { %581 = vmatprep.subr.bf16.mxu0 %v580_v58 }
  0xa5   :  { %583 = vmatpush3.bf16.msra.mxu0 %v580_v58 }
 0x157   :  { %v174_v49 = vpop.f32.mrb[0].mxu0 }
 0x158   :  { %v448_v51 = vpop.f32.mrb[1].mxu0  ;;  %v175_v52 = vadd.f32 %v174_v49, %v123_v48 }
 0x159   :  { %v177_v53 = vpop.f32.mrb[2].mxu0 }
 0x15a   :  { %v178_v54 = vadd.f32 %v177_v53, %v124_v50  ;;  %v449_v55 = vpop.f32.mrb[3].mxu0  ;;  %482 = vmatprep.mubr.f32.mxu1 %v175_v52 }
 0x15c   :  { %483 = vmatmul.mubr.f32.vlgmr.msra.gmra.mrb[0].mxu1 %v178_v54 }
 0x22f   :  { %v484_v60 = vpop.f32.mrb[0].mxu1 }
 0x230   :  { %v276_v61 = vadd.f32 %v484_v60, %v404_v59  ;;  %v270_v62 = vpop.f32.mrb[1].mxu1 }
 0x231   :  { %v271_v63 = vadd.f32 %v404_v59, %v270_v62 }
 0x232   :  { %v280_v1 = vmax.f32 %v276_v61, 0.0 }
 0x233   :  { %v279_v0 = vmax.f32 %v271_v63, 0.0 }
 0x235   :  { %517 = vmatprep.mubr.f32.mxu0 %v279_v0 }
 0x236   :  { %518 = vmatmul.mubr.f32.vlgmr.msra.gmra.mrb[4].mxu0 %v280_v1 }
 0x309   :  { %v519_v3 = vpop.f32.mrb[4].mxu0 }
 0x30a   :  { %v376_v4 = vadd.f32 %v519_v3, %v405_v2  ;;  %v370_v5 = vpop.f32.mrb[5].mxu0 }
 0x30b   :  { %v371_v6 = vadd.f32 %v405_v2, %v370_v5 }
 0x30c   :  { %380 = vst [vmem:[#allocation14 + $0x8] sm:$0xff] %v376_v4 }
 0x30d   :  { %379 = vst [vmem:[#allocation14] sm:$0xff] %v371_v6 }
 0x30e   :  { %765 = shalt.err (!%p762_p4)
}
 0x30f   :  { %s766_s21 = scalar_lea.hbm %s961_s7, 256 }
 0x310   :  { %p767_p5 = scmp.ne.s32.totalorder %s961_s7, %s766_s21  ;;  %p770_p6 = scmp.lt.u32.totalorder %s766_s21, %s961_s7 }
 0x312   :  { %p772_p7 = pnand %p770_p6, %p767_p5 }
 0x314   :  { %775 = shalt.err (!%p772_p7)
}
 0x315   :  { %392 = dma.vmem_to_hbm [thread:$0]  %s387_s11, 256, %s961_s7, [#allocation4], %s791_s25, %s791_s25, %s792_s27  }
 0x316   :  { %784 = dma.done.wait [#allocation4], 256  }
 0x317   :  { %785 = vsyncadd [#allocation4], 4294967040 }
 0x318   :  { %396 = vsyncpa [#allocation3], 1 }
 0x319   :  { %397 = vsyncpa [#allocation6], 1 }
 0x31a   :  { %398 = vsyncpa [#allocation9], 1 }
 0x31b   :  { %399 = vsyncpa [#allocation12], 1 }
 0x31c   :  { %400 = vsyncpa [#allocation4], 1 }

</bundles_post_ra>
